<compile_context>
chip_gen: v7x
topology: tpu7x:2x2x1
jax: 0.10.0
libtpu: 0.0.40
codegen_flags: <defaults>
</compile_context>

<pallas_src>
import functools

import jax
import jax.numpy as jnp
from jax.experimental import pallas as pl
from jax.experimental.pallas import tpu as pltpu


def _mlp_kernel(n_layers, acts, compute_dtype, hidden_epilogue_dtype, *refs):
    """Fused feature-major MLP.

    refs = (x_ref, w0, b0, w1, b1, ..., o_ref)
      x_ref: (in_dim, tile)   compute_dtype   -- rows on the lane axis
      w_i:   (out_i, in_i)    compute_dtype   -- PyTorch (out, in) layout
      b_i:   (out_i, 1)       hidden_epilogue_dtype (hidden) / f32 (last)
      o_ref: (out_dim, tile)  out dtype       -- lane-dense store
    """
    x_ref = refs[0]
    o_ref = refs[-1]
    h = x_ref[...]                                       # (in_dim, tile)
    for i in range(n_layers):
        w_ref = refs[1 + 2 * i]
        b_ref = refs[2 + 2 * i]
        # out_i stays on the (small) sublane-side dim; the big M tile stays
        # lane-dense.  Accumulate in f32 on the MXU.
        acc = jnp.dot(w_ref[...], h, preferred_element_type=jnp.float32)
        if i + 1 == n_layers:
            # Final layer: f32 epilogue, single cast at the store.
            y = acc + b_ref[...]
            if acts[i]:
                y = jnp.maximum(y, 0.0)
            o_ref[...] = y.astype(o_ref.dtype)
        else:
            # Hidden layers: epilogue in the (narrow) epilogue dtype — halves
            # the VPU op count on v6e/v7x; the result feeds another matmul.
            y = acc.astype(hidden_epilogue_dtype) + b_ref[...]
            if acts[i]:
                y = jnp.maximum(y, 0.0)
            h = y.astype(compute_dtype)


def s_encoder_forward(xy_context, weights, biases, acts, *,
                      col_tile=None, compute_dtype=jnp.bfloat16,
                      out_dtype=None, hidden_epilogue_dtype=None,
                      layout="bnd",
                      vmem_budget_bytes=24 * 1024 * 1024,
                      min_grid_steps=2):
    """Run the S_encoder MLP with a single fused Pallas kernel.

    xy_context: (B, N, input_dim) float32
    weights[i]: (out_i, in_i)   -- PyTorch nn.Linear layout (no transpose)
    biases[i]:  (out_i,)        (any shape that reshapes to (out_i, 1))
    acts[i]:    bool, whether layer i is followed by an activation (ReLU)
    layout:     "bnd" -> (B, N, out_dim) (module semantics, one transpose)
                "feature_major" -> (out_dim, B, N) (no transpose; for fusion)
    """
    if out_dtype is None:
        out_dtype = compute_dtype
    if hidden_epilogue_dtype is None:
        hidden_epilogue_dtype = compute_dtype   # use jnp.float32 on v5e

    B, N, D = xy_context.shape
    M = B * N
    n_layers = len(weights)
    out_dim = weights[-1].shape[0]
    max_width = max([D] + [w.shape[0] for w in weights])

    # ---- lane tile selection ------------------------------------------------
    bytes_in = jnp.dtype(compute_dtype).itemsize
    bytes_out = jnp.dtype(out_dtype).itemsize
    # Per-lane VMEM cost of one grid step: double-buffered input block,
    # double-buffered output block, plus live intermediates (f32 matmul result
    # and its compute-dtype recast).
    per_lane_bytes = (2 * D * bytes_in
                      + 2 * out_dim * bytes_out
                      + max_width * (4 + bytes_in))
    budget_tile = max(128, (vmem_budget_bytes // per_lane_bytes) // 128 * 128)

    m_lane = pl.cdiv(M, 128) * 128
    if col_tile is None:
        col_tile = budget_tile            # grow to fill the VMEM budget
    else:
        assert col_tile >= 128 and col_tile % 128 == 0
        col_tile = min(col_tile, budget_tile)
    # Don't pad tiny problems up to a huge tile.
    col_tile = min(col_tile, m_lane)
    # Keep >=2 grid steps (when M allows) so ("parallel",) can shard the grid
    # across v7x's 2 TensorCores; harmless on single-TC v5e/v6e.
    if min_grid_steps > 1:
        col_tile = min(col_tile,
                       max(128, pl.cdiv(M, min_grid_steps * 128) * 128))

    M_pad = pl.cdiv(M, col_tile) * col_tile
    grid = (M_pad // col_tile,)

    # ---- feature-major operands --------------------------------------------
    # Cast first so the transpose/pad moves narrow elements, then pad lanes.
    x_t = xy_context.reshape(M, D).astype(compute_dtype).T     # (D, M)
    if M_pad != M:
        x_t = jnp.pad(x_t, ((0, 0), (0, M_pad - M)))

    in_specs = [pl.BlockSpec((D, col_tile), lambda i: (0, i))]
    operands = [x_t]
    for li, (w, b) in enumerate(zip(weights, biases)):
        is_last = (li + 1 == n_layers)
        w_c = w.astype(compute_dtype)                          # (out, in)
        b_dt = jnp.float32 if is_last else hidden_epilogue_dtype
        b_c = b.reshape(-1, 1).astype(b_dt)                    # (out, 1)
        # Weights/biases are tiny: whole-array block, constant block index
        # (Mosaic keeps them resident; no per-step re-fetch).
        in_specs.append(pl.BlockSpec(w_c.shape, lambda i: (0, 0)))
        in_specs.append(pl.BlockSpec(b_c.shape, lambda i: (0, 0)))
        operands.append(w_c)
        operands.append(b_c)

    out_spec = pl.BlockSpec((out_dim, col_tile), lambda i: (0, i))

    kernel = functools.partial(
        _mlp_kernel, n_layers, tuple(bool(a) for a in acts),
        compute_dtype, hidden_epilogue_dtype)

    out_t = pl.pallas_call(
        kernel,
        out_shape=jax.ShapeDtypeStruct((out_dim, M_pad), out_dtype),
        grid_spec=pltpu.PrefetchScalarGridSpec(
            num_scalar_prefetch=0,
            grid=grid,
            in_specs=in_specs,
            out_specs=out_spec,
        ),
        compiler_params=pltpu.CompilerParams(
            dimension_semantics=("parallel",),
            vmem_limit_bytes=max(vmem_budget_bytes + (8 << 20), 32 << 20),
        ),
    )(*operands)

    out_t = out_t[:, :M]                  # drop lane padding
    if layout == "feature_major":
        # Transpose-free path for consumers that accept (out_dim, B, N)
        # (e.g. the downstream ANP mean-over-N aggregation).
        return out_t.reshape(out_dim, B, N)
    # Module semantics: (B, N, out_dim).
    return out_t.T.reshape(B, N, out_dim)


def reference_forward_matched(xy_context, weights, biases, acts, compute_dtype,
                              hidden_epilogue_dtype=None, out_dtype=None):
    """Pure-JAX reference mirroring the kernel's orientation & dtype policy."""
    if hidden_epilogue_dtype is None:
        hidden_epilogue_dtype = compute_dtype
    if out_dtype is None:
        out_dtype = compute_dtype
    B, N, D = xy_context.shape
    h = xy_context.reshape(B * N, D).astype(compute_dtype).T
    n_layers = len(weights)
    for i, (w, b, a) in enumerate(zip(weights, biases, acts)):
        acc = jnp.dot(w.astype(compute_dtype), h,
                      preferred_element_type=jnp.float32)
        if i + 1 == n_layers:
            y = acc + b.reshape(-1, 1).astype(jnp.float32)
            if a:
                y = jnp.maximum(y, 0.0)
            h = y.astype(out_dtype)
        else:
            y = (acc.astype(hidden_epilogue_dtype)
                 + b.reshape(-1, 1).astype(hidden_epilogue_dtype))
            if a:
                y = jnp.maximum(y, 0.0)
            h = y.astype(compute_dtype)
    return h.T.reshape(B, N, weights[-1].shape[0])


def reference_forward_module(xy_context, weights, biases, acts):
    """Row-major f32 reference matching the PyTorch module's forward."""
    h = xy_context
    for w, b, a in zip(weights, biases, acts):
        h = h @ w.T + b
        if a:
            h = jnp.maximum(h, 0.0)
    return h


if __name__ == "__main__":
    # s_encoder_specs analogue: [(32, ReLU()), (32, ReLU()), (32, None)]
    input_dim = 6
    specs = [(32, True), (32, True), (32, False)]

    key = jax.random.PRNGKey(0)

    # PyTorch layout: weight is (out, in); init_func = normal_ on weights,
    # small deterministic bias init (synthetic, not a checkpoint).
    weights, biases, acts = [], [], []
    prev = input_dim
    for width, act in specs:
        key, kw, kb = jax.random.split(key, 3)
        weights.append(jax.random.normal(kw, (width, prev), dtype=jnp.float32))
        biases.append(0.01 * jax.random.normal(kb, (width,), dtype=jnp.float32))
        acts.append(act)
        prev = width
    out_dim = specs[-1][0]

    for (B, N) in [(2, 8), (4, 96)]:       # second case exercises grid>1 + padding
        key, kx = jax.random.split(key)
        xy_context = jax.random.normal(kx, (B, N, input_dim), dtype=jnp.float32)

        ref_f32 = reference_forward_module(xy_context, weights, biases, acts)
        scale = float(jnp.maximum(jnp.max(jnp.abs(ref_f32)), 1.0))

        # --- bf16-in / f32-accumulate / bf16-out (fast path on v6e / v7x) ---
        out_bf16 = jax.block_until_ready(
            s_encoder_forward(xy_context, weights, biases, acts,
                              compute_dtype=jnp.bfloat16))
        ref_bf16 = reference_forward_matched(xy_context, weights, biases, acts,
                                             jnp.bfloat16)
        assert out_bf16.shape == ref_f32.shape == (B, N, out_dim)
        assert out_bf16.dtype == jnp.bfloat16
        err_matched = float(jnp.max(jnp.abs(
            out_bf16.astype(jnp.float32) - ref_bf16.astype(jnp.float32))))
        assert err_matched / scale < 1e-2
        err_vs_f32 = float(jnp.max(jnp.abs(
            out_bf16.astype(jnp.float32) - ref_f32)))
        assert err_vs_f32 / scale < 5e-2

        # --- transpose-free feature-major output (same kernel, no wrapper T) ---
        out_fm = jax.block_until_ready(
            s_encoder_forward(xy_context, weights, biases, acts,
                              compute_dtype=jnp.bfloat16,
                              layout="feature_major"))
        assert out_fm.shape == (out_dim, B, N)
        err_fm = float(jnp.max(jnp.abs(
            out_fm.transpose(1, 2, 0).astype(jnp.float32)
            - ref_bf16.astype(jnp.float32))))
        assert err_fm / scale < 1e-2

        # --- exact-f32 path (matches the PyTorch module's arithmetic) ---
        out_f32 = jax.block_until_ready(
            s_encoder_forward(xy_context, weights, biases, acts,
                              compute_dtype=jnp.float32))
        assert out_f32.shape == (B, N, out_dim)
        assert out_f32.dtype == jnp.float32
        assert float(jnp.max(jnp.abs(out_f32 - ref_f32))) / scale < 2e-2

    print("KERNEL_OK")
</pallas_src>

<mosaic_0001>
module attributes {stable_mosaic.version = 11 : i64} {
  func.func @_mlp_kernel(%arg0: i32, %arg1: memref<6x128xbf16, #tpu.memory_space<vmem>>, %arg2: memref<32x6xbf16, #tpu.memory_space<vmem>>, %arg3: memref<32x1xbf16, #tpu.memory_space<vmem>>, %arg4: memref<32x32xbf16, #tpu.memory_space<vmem>>, %arg5: memref<32x1xbf16, #tpu.memory_space<vmem>>, %arg6: memref<32x32xbf16, #tpu.memory_space<vmem>>, %arg7: memref<32x1xf32, #tpu.memory_space<vmem>>, %arg8: memref<32x128xbf16, #tpu.memory_space<vmem>>) attributes {dimension_semantics = [#tpu.dimension_semantics<parallel>], iteration_bounds = array<i64: 1>, scalar_prefetch = 0 : i64, scratch_operands = 0 : i64, tpu.core_type = #tpu.core_type<tc>, window_params = [{transform_indices = @transform_0, window_bounds = array<i64: 6, 128>}, {pipeline_mode = #tpu.pipeline_mode<synchronous>, transform_indices = @transform_1, window_bounds = array<i64: 32, 6>}, {pipeline_mode = #tpu.pipeline_mode<synchronous>, transform_indices = @transform_2, window_bounds = array<i64: 32, 1>}, {pipeline_mode = #tpu.pipeline_mode<synchronous>, transform_indices = @transform_3, window_bounds = array<i64: 32, 32>}, {pipeline_mode = #tpu.pipeline_mode<synchronous>, transform_indices = @transform_4, window_bounds = array<i64: 32, 1>}, {pipeline_mode = #tpu.pipeline_mode<synchronous>, transform_indices = @transform_5, window_bounds = array<i64: 32, 32>}, {pipeline_mode = #tpu.pipeline_mode<synchronous>, transform_indices = @transform_6, window_bounds = array<i64: 32, 1>}, {transform_indices = @transform_7, window_bounds = array<i64: 32, 128>}]} {
    %c0 = arith.constant 0 : index
    %c0_0 = arith.constant 0 : index
    %0 = vector.load %arg1[%c0, %c0_0] : memref<6x128xbf16, #tpu.memory_space<vmem>>, vector<6x128xbf16>
    %c0_1 = arith.constant 0 : index
    %c0_2 = arith.constant 0 : index
    %1 = vector.load %arg2[%c0_1, %c0_2] : memref<32x6xbf16, #tpu.memory_space<vmem>>, vector<32x6xbf16>
    %cst = arith.constant dense<0.000000e+00> : vector<32x128xf32>
    %2 = tpu.matmul %1, %0, %cst {dimension_numbers = #tpu.dot_dimension_numbers<[1], [0], [0], [1], [0, 0, 1, 1], [], []>} : vector<32x6xbf16>, vector<6x128xbf16>, vector<32x128xf32> -> vector<32x128xf32>
    %3 = arith.truncf %2 : vector<32x128xf32> to vector<32x128xbf16>
    %c0_3 = arith.constant 0 : index
    %c0_4 = arith.constant 0 : index
    %4 = vector.load %arg3[%c0_3, %c0_4] : memref<32x1xbf16, #tpu.memory_space<vmem>>, vector<32x1xbf16>
    %5 = vector.broadcast %4 : vector<32x1xbf16> to vector<32x128xbf16>
    %6 = arith.addf %3, %5 : vector<32x128xbf16>
    %cst_5 = arith.constant 0.000000e+00 : bf16
    %7 = vector.broadcast %cst_5 : bf16 to vector<32x128xbf16>
    %8 = arith.maximumf %6, %7 : vector<32x128xbf16>
    %c0_6 = arith.constant 0 : index
    %c0_7 = arith.constant 0 : index
    %9 = vector.load %arg4[%c0_6, %c0_7] : memref<32x32xbf16, #tpu.memory_space<vmem>>, vector<32x32xbf16>
    %cst_8 = arith.constant dense<0.000000e+00> : vector<32x128xf32>
    %10 = tpu.matmul %9, %8, %cst_8 {dimension_numbers = #tpu.dot_dimension_numbers<[1], [0], [0], [1], [0, 0, 1, 1], [], []>} : vector<32x32xbf16>, vector<32x128xbf16>, vector<32x128xf32> -> vector<32x128xf32>
    %11 = arith.truncf %10 : vector<32x128xf32> to vector<32x128xbf16>
    %c0_9 = arith.constant 0 : index
    %c0_10 = arith.constant 0 : index
    %12 = vector.load %arg5[%c0_9, %c0_10] : memref<32x1xbf16, #tpu.memory_space<vmem>>, vector<32x1xbf16>
    %13 = vector.broadcast %12 : vector<32x1xbf16> to vector<32x128xbf16>
    %14 = arith.addf %11, %13 : vector<32x128xbf16>
    %cst_11 = arith.constant 0.000000e+00 : bf16
    %15 = vector.broadcast %cst_11 : bf16 to vector<32x128xbf16>
    %16 = arith.maximumf %14, %15 : vector<32x128xbf16>
    %c0_12 = arith.constant 0 : index
    %c0_13 = arith.constant 0 : index
    %17 = vector.load %arg6[%c0_12, %c0_13] : memref<32x32xbf16, #tpu.memory_space<vmem>>, vector<32x32xbf16>
    %cst_14 = arith.constant dense<0.000000e+00> : vector<32x128xf32>
    %18 = tpu.matmul %17, %16, %cst_14 {dimension_numbers = #tpu.dot_dimension_numbers<[1], [0], [0], [1], [0, 0, 1, 1], [], []>} : vector<32x32xbf16>, vector<32x128xbf16>, vector<32x128xf32> -> vector<32x128xf32>
    %c0_15 = arith.constant 0 : index
    %c0_16 = arith.constant 0 : index
    %19 = vector.load %arg7[%c0_15, %c0_16] : memref<32x1xf32, #tpu.memory_space<vmem>>, vector<32x1xf32>
    %20 = vector.broadcast %19 : vector<32x1xf32> to vector<32x128xf32>
    %21 = arith.addf %18, %20 : vector<32x128xf32>
    %22 = arith.truncf %21 : vector<32x128xf32> to vector<32x128xbf16>
    %c0_17 = arith.constant 0 : index
    %c0_18 = arith.constant 0 : index
    %23 = vector.load %arg8[%c0_17, %c0_18] : memref<32x128xbf16, #tpu.memory_space<vmem>>, vector<32x128xbf16>
    tpu.vector_store %arg8[%c0_17, %c0_18], %22 {strides = array<i32>} : memref<32x128xbf16, #tpu.memory_space<vmem>>, vector<32x128xbf16>,
    return
  }
  func.func @transform_0(%arg0: i32) -> (i32, i32) {
    %c0_i32 = arith.constant 0 : i32
    %c0_i32_0 = arith.constant 0 : i32
    return %c0_i32, %arg0 : i32, i32
  }
  func.func @transform_1(%arg0: i32) -> (i32, i32) {
    %c0_i32 = arith.constant 0 : i32
    %c0_i32_0 = arith.constant 0 : i32
    %c0_i32_1 = arith.constant 0 : i32
    return %c0_i32, %c0_i32_0 : i32, i32
  }
  func.func @transform_2(%arg0: i32) -> (i32, i32) {
    %c0_i32 = arith.constant 0 : i32
    %c0_i32_0 = arith.constant 0 : i32
    %c0_i32_1 = arith.constant 0 : i32
    return %c0_i32, %c0_i32_0 : i32, i32
  }
  func.func @transform_3(%arg0: i32) -> (i32, i32) {
    %c0_i32 = arith.constant 0 : i32
    %c0_i32_0 = arith.constant 0 : i32
    %c0_i32_1 = arith.constant 0 : i32
    return %c0_i32, %c0_i32_0 : i32, i32
  }
  func.func @transform_4(%arg0: i32) -> (i32, i32) {
    %c0_i32 = arith.constant 0 : i32
    %c0_i32_0 = arith.constant 0 : i32
    %c0_i32_1 = arith.constant 0 : i32
    return %c0_i32, %c0_i32_0 : i32, i32
  }
  func.func @transform_5(%arg0: i32) -> (i32, i32) {
    %c0_i32 = arith.constant 0 : i32
    %c0_i32_0 = arith.constant 0 : i32
    %c0_i32_1 = arith.constant 0 : i32
    return %c0_i32, %c0_i32_0 : i32, i32
  }
  func.func @transform_6(%arg0: i32) -> (i32, i32) {
    %c0_i32 = arith.constant 0 : i32
    %c0_i32_0 = arith.constant 0 : i32
    %c0_i32_1 = arith.constant 0 : i32
    return %c0_i32, %c0_i32_0 : i32, i32
  }
  func.func @transform_7(%arg0: i32) -> (i32, i32) {
    %c0_i32 = arith.constant 0 : i32
    %c0_i32_0 = arith.constant 0 : i32
    return %c0_i32, %arg0 : i32, i32
  }
}

</mosaic_0001>

<bundles_post_ra>
// kernel: tpu_custom_call.1
= control target key start
LH: loop header
LB: loop body
LE: loop exit
PB: predicated region body
PF: predicated region fallthrough
CT: control target
= control target key end

     0   :  { %vm50_vm0 = vcmask 1042432   ;;  %vm43_vm1 = vcmask 48128   ;;  %v548_v5 = vmov 0   ;;  %s672_s0 = inlined_call_operand.vmem [shape: bf16[6,128], index: 0, kind: input, shape index: {}]   ;;  %s673_s1 = inlined_call_operand.vmem [shape: bf16[32,6], index: 1, kind: input, shape index: {}]   ;;  %s674_s2 = inlined_call_operand.vmem [shape: bf16[32,1], index: 2, kind: input, shape index: {}]   ;;  %s675_s3 = inlined_call_operand.vmem [shape: bf16[32,32], index: 3, kind: input, shape index: {}]   ;;  %s676_s4 = inlined_call_operand.vmem [shape: bf16[32,1], index: 4, kind: input, shape index: {}]   ;;  %s677_s5 = inlined_call_operand.vmem [shape: bf16[32,32], index: 5, kind: input, shape index: {}]   ;;  %s678_s6 = inlined_call_operand.vmem [shape: f32[32,1], index: 6, kind: input, shape index: {}]   ;;  %s679_s7 = inlined_call_operand.hbm [shape: bf16[32,128], index: 7, kind: output, shape index: {}]  }
   0x1   :  { %v28_v0 = vld [vmem:[%s672_s0] sm:$0x7]  ;;  %v519_v3 = vld [vmem:[%s673_s1 + $0x8] sm:$0xff]   ;;  %516 = vset.pattern.permute.xlu0 %v548_v5  ;;  %517 = vset.pattern.permute.xlu1 %v548_v5  ;;  %v106_v7 = vld [vmem:[%s674_s2 + $0x4] sm:$0xf] }
   0x2   :  { %v518_v1 = vld [vmem:[%s673_s1] sm:$0xff]   ;;  %510 = vmatprep.subr.msk.bf16.mxu0 %vm50_vm0, %v28_v0  ;;  %v52_v2 = vsel %vm50_vm0, %v28_v0, 0  ;;  %v107_v6 = vld [vmem:[%s674_s2 + $0x8] sm:$0xf]  ;;  %v108_v8 = vld [vmem:[%s674_s2 + $0xc] sm:$0xf] }
   0x3   :  { %489 = vmatpush3.bf16.msra.mxu0 %v52_v2  ;;  %490 = vmatprep.mubr.msk.bf16.mxu0 %vm43_vm1, %v518_v1  ;;  %v105_v4 = vld [vmem:[%s674_s2] sm:$0xf]  ;;  %v246_v10 = vld [vmem:[%s676_s4 + $0x4] sm:$0xf] }
   0x4   :  { %111 = vperm.xlu0 %516, %v105_v4   ;;  %135 = vperm.xlu1 %517, %v107_v6   ;;  %v245_v9 = vld [vmem:[%s676_s4] sm:$0xf] }
   0x6   :  { %491 = vmatmul.mubr.msk.bf16.vlgmr.msra.gmra.mrb[0].mxu0 %vm43_vm1, %v519_v3 }
   0x8   :  { %123 = vperm.xlu0 %516, %v106_v7   ;;  %147 = vperm.xlu1 %517, %v108_v8  }
   0x9   :  { %12 = vsyncpa [#allocation3], 0  ;;  %v247_v11 = vld [vmem:[%s676_s4 + $0x8] sm:$0xf]  ;;  %v248_v12 = vld [vmem:[%s676_s4 + $0xc] sm:$0xf]  ;;  %v117_v20 = vlaneseq }
   0xa   :  { %v317_v13 = vld [vmem:[%s678_s6] sm:$0xff]  ;;  %v318_v14 = vld [vmem:[%s678_s6 + $0x8] sm:$0xff]  ;;  %v319_v15 = vld [vmem:[%s678_s6 + $0x10] sm:$0xff]  ;;  %vm187_vm2 = vcmask 261120   ;;  %v549_v18 = vmov 839922192  }
   0xb   :  { %v320_v16 = vld [vmem:[%s678_s6 + $0x18] sm:$0xff]  ;;  %v520_v17 = vld [vmem:[%s675_s3] sm:$0xff]   ;;  %v115_v19 = vunpack.c.l.s4 %v549_v18  ;;  %v118_v23 = vshrl.u32 %v117_v20, 7  ;;  %v521_v44 = vld [vmem:[%s675_s3 + $0x8] sm:$0xff]   ;;  %s550_s9 = smov [#allocation2]  }
   0xc   :  { %251 = vperm.xlu0 %516, %v245_v9   ;;  %263 = vperm.xlu1 %517, %v246_v10   ;;  %v522_v45 = vld [vmem:[%s677_s5] sm:$0xff]   ;;  %v523_v2 = vld [vmem:[%s677_s5 + $0x8] sm:$0xff]   ;;  %s431_s10 = sshll.u32 %s550_s9, 4  ;;  %s432_s10 = int_to_ptr.vmem [resolvable:$true] %s431_s10 }
   0xd   :  { %498 = vmatprep.mubr.msk.bf16.mxu1 %vm187_vm2, %v520_v17  ;;  %v116_v22 = vunpack.c.0.s8 %v115_v19  ;;  %506 = vmatprep.mubr.msk.bf16.mxu0 %vm187_vm2, %v522_v45  ;;  %s524_s5 = scalar_lea.vmem %s432_s10, 256  ;;  %p529_p1 = scmp.lt.s32.totalorder %s432_s10, %s432_s10 }
   0xe   :  { %p525_p0 = scmp.ne.s32.totalorder %s432_s10, %s524_s5  ;;  %p530_p2 = scmp.lt.s32.totalorder %s524_s5, %s524_s5 }
   0xf   :  { %v119_v25 = vsub.s32 %v116_v22, %v118_v23 }
  0x10   :  { %275 = vperm.xlu0 %516, %v247_v11   ;;  %287 = vperm.xlu1 %517, %v248_v12   ;;  %p531_p3 = por %p530_p2, %p529_p1 }
  0x12   :  { %p532_p4 = pnand %p531_p3, %p525_p0 }
  0x14   :  { %323 = vperm.xlu0 %516, %v317_v13   ;;  %328 = vperm.xlu1 %517, %v318_v14  }
  0x18   :  { %333 = vperm.xlu0 %516, %v319_v15   ;;  %338 = vperm.xlu1 %517, %v320_v16  }
  0x83   :  { %v136_v21 = vpop.permute.xlu1 %135  ;;  %v112_v24 = vpop.permute.xlu0 %111 }
  0x84   :  { %v144_v27 = vrot.slane %v136_v21, %v119_v25  ;;  %v120_v30 = vrot.slane %v112_v24, %v119_v25 }
  0x87   :  { %v148_v26 = vpop.permute.xlu1 %147  ;;  %v124_v29 = vpop.permute.xlu0 %123 }
  0x88   :  { %v156_v28 = vrot.slane %v148_v26, %v119_v25  ;;  %v132_v31 = vrot.slane %v124_v29, %v119_v25 }
  0x8a   :  { %v447_v34 = vcombine.low %v144_v27, %v156_v28  ;;  %v446_v38 = vcombine.low %v120_v30, %v132_v31 }
  0x8b   :  { %v252_v46 = vpop.permute.xlu0 %251  ;;  %v264_v47 = vpop.permute.xlu1 %263 }
  0x8c   :  { %v260_v52 = vrot.slane %v252_v46, %v119_v25  ;;  %v272_v53 = vrot.slane %v264_v47, %v119_v25 }
  0x8e   :  { %v452_v60 = vcombine.low %v260_v52, %v272_v53 }
  0x8f   :  { %v276_v48 = vpop.permute.xlu0 %275  ;;  %v288_v49 = vpop.permute.xlu1 %287 }
  0x90   :  { %v284_v50 = vrot.slane %v276_v48, %v119_v25  ;;  %v296_v51 = vrot.slane %v288_v49, %v119_v25 }
  0x92   :  { %v453_v57 = vcombine.low %v284_v50, %v296_v51 }
  0x93   :  { %v324_v3 = vpop.permute.xlu0 %323  ;;  %v329_v4 = vpop.permute.xlu1 %328 }
  0x97   :  { %v334_v7 = vpop.permute.xlu0 %333  ;;  %v339_v9 = vpop.permute.xlu1 %338 }
  0xd9   :  { %v492_v32 = vpop.f32.mrb[0].mxu0 }
  0xda   :  { %v88_v33 = vpop.f32.mrb[1].mxu0 }
  0xdb   :  { %v493_v35 = vpop.f32.mrb[2].mxu0 }
  0xdc   :  { %v104_v36 = vpack.c.bf16 %v493_v35, %v492_v32  ;;  %v91_v37 = vpop.f32.mrb[3].mxu0 }
  0xdd   :  { %v103_v39 = vpack.c.bf16 %v91_v37, %v88_v33 }
  0xde   :  { %v170_v40 = vadd.bf16 %v447_v34, %v104_v36 }
  0xdf   :  { %v169_v41 = vadd.bf16 %v446_v38, %v103_v39 }
  0xe0   :  { %v172_v43 = vmax.bf16 %v548_v5, %v170_v40 }
  0xe1   :  { %v171_v42 = vmax.bf16 %v548_v5, %v169_v41 }
  0xe3   :  { %494 = vmatprep.subr.bf16.mxu1 %v171_v42 }
  0xe4   :  { %495 = vmatpush3.bf16.msra.mxu1 %v171_v42 }
  0xe5   :  { %496 = vmatprep.subr.bf16.mxu1 %v172_v43 }
  0xe8   :  { %497 = vmatpush3.bf16.msra.mxu1 %v172_v43 }
  0xeb   :  { %499 = vmatmul.mubr.msk.bf16.vlgmr.msra.gmra.mrb[0].mxu1 %vm187_vm2, %v521_v44 }
 0x1be   :  { %v500_v54 = vpop.f32.mrb[0].mxu1 }
 0x1bf   :  { %v228_v55 = vpop.f32.mrb[1].mxu1 }
 0x1c0   :  { %v501_v56 = vpop.f32.mrb[2].mxu1 }
 0x1c1   :  { %v244_v58 = vpack.c.bf16 %v501_v56, %v500_v54  ;;  %v231_v59 = vpop.f32.mrb[3].mxu1 }
 0x1c2   :  { %v243_v61 = vpack.c.bf16 %v231_v59, %v228_v55 }
 0x1c3   :  { %v310_v62 = vadd.bf16 %v453_v57, %v244_v58 }
 0x1c4   :  { %v309_v63 = vadd.bf16 %v452_v60, %v243_v61 }
 0x1c5   :  { %v312_v1 = vmax.bf16 %v548_v5, %v310_v62 }
 0x1c6   :  { %v311_v0 = vmax.bf16 %v548_v5, %v309_v63 }
 0x1c8   :  { %502 = vmatprep.subr.bf16.mxu0 %v311_v0 }
 0x1c9   :  { %503 = vmatpush3.bf16.msra.mxu0 %v311_v0 }
 0x1ca   :  { %504 = vmatprep.subr.bf16.mxu0 %v312_v1 }
 0x1cd   :  { %505 = vmatpush3.bf16.msra.mxu0 %v312_v1 }
 0x1d0   :  { %507 = vmatmul.mubr.msk.bf16.vlgmr.msra.gmra.mrb[4].mxu0 %vm187_vm2, %v523_v2 }
 0x2a3   :  { %v508_v6 = vpop.f32.mrb[4].mxu0 }
 0x2a4   :  { %v391_v8 = vpop.f32.mrb[5].mxu0  ;;  %v400_v11 = vadd.f32 %v508_v6, %v334_v7 }
 0x2a5   :  { %v509_v10 = vpop.f32.mrb[6].mxu0  ;;  %v392_v13 = vadd.f32 %v391_v8, %v324_v3 }
 0x2a6   :  { %v403_v5 = vadd.f32 %v509_v10, %v339_v9  ;;  %v394_v12 = vpop.f32.mrb[7].mxu0 }
 0x2a7   :  { %v395_v14 = vadd.f32 %v394_v12, %v329_v4 }
 0x2a8   :  { %v474_v15 = vpack.c.bf16 %v403_v5, %v400_v11 }
 0x2a9   :  { %v469_v16 = vpack.c.bf16 %v395_v14, %v392_v13 }
 0x2aa   :  { %476 = vst [vmem:[#allocation2 + $0x8] sm:$0xff] %v474_v15  }
 0x2ab   :  { %470 = vst [vmem:[#allocation2] sm:$0xff] %v469_v16  }
 0x2ac   :  { %535 = shalt.err (!%p532_p4)
}
 0x2ad   :  { %s536_s12 = scalar_lea.hbm %s679_s7, 256 }
 0x2ae   :  { %p537_p5 = scmp.ne.s32.totalorder %s679_s7, %s536_s12  ;;  %p540_p6 = scmp.lt.u32.totalorder %s536_s12, %s679_s7 }
 0x2b0   :  { %p542_p7 = pnand %p540_p6, %p537_p5 }
 0x2b2   :  { %545 = shalt.err (!%p542_p7)
}
 0x2b3   :  { %s551_s17 = smov 64   ;;  %s552_s18 = smov 4  }
 0x2b4   :  { %437 = dma.vmem_to_hbm [thread:$0]  %s432_s10, 256, %s679_s7, [#allocation3], %s551_s17, %s551_s17, %s552_s18  }
 0x2b5   :  { %546 = dma.done.wait [#allocation3], 256  }
 0x2b6   :  { %547 = vsyncadd [#allocation3], 4294967040 }
 0x2b7   :  { %441 = vsyncpa [#allocation3], 1 }

</bundles_post_ra>
